<compile_context>
chip_gen: v5e
topology: v5e:2x2
jax: 0.10.0
libtpu: 0.0.40
codegen_flags: <defaults>
</compile_context>

<pallas_src>
import jax
import jax.numpy as jnp
from jax.experimental import pallas as pl
from jax.experimental.pallas import tpu as pltpu

EPS = 1e-5  # PyTorch BatchNorm2d default


def _make_conv_stats_kernel(Cin, Cout, H, W):
    HW = H * W
    w_pow2 = (W & (W - 1)) == 0

    def conv_stats_kernel(x_ref, w_ref, conv_ref, stats_ref):
        """3x3 conv (implicit zero pad) of one image + per-channel partial stats.

        x_ref:     (1, Cin, H*W)  bf16  -- flattened *unpadded* image (CHW)
        w_ref:     (Cout, 9*Cin)  bf16  -- tap layout (dy*3+dx)*Cin + ci
        conv_ref:  (1, Cout, H*W) bf16  -- lane-dense conv output slab
        stats_ref: (1, Cout, 2)   f32   -- [:, :, 0]=sum, [:, :, 1]=sum(x^2)
        """
        # f32 for the XLU lane rotations (native 32-bit rotate path); the
        # bf16->f32->bf16 round trip is lossless.
        x = x_ref[0].astype(jnp.float32)                      # (Cin, HW)

        # Lane index p = y*W + x over the flattened image; edge masks emulate
        # the 1-pixel zero padding of the 3x3 conv.
        p_idx = jax.lax.broadcasted_iota(jnp.int32, (1, HW), 1)
        if w_pow2:
            col = p_idx & (W - 1)
        else:
            col = p_idx % W  # TODO(synk): verify i32 vector rem for non-pow2 W
        row_ok = (p_idx >= W, None, p_idx < (H - 1) * W)      # dy = 0, 1, 2
        col_ok = (col >= 1, None, col <= W - 2)               # dx = 0, 1, 2

        slabs = []
        for dy in range(3):
            for dx in range(3):
                # Source offset in flattened coords: patch[p] = x[p + s].
                s = (dy - 1) * W + (dx - 1)
                t = x if s == 0 else pltpu.roll(x, (-s) % HW, 1)
                r, c = row_ok[dy], col_ok[dx]
                m = r if c is None else (c if r is None else r & c)
                if m is not None:
                    t = jnp.where(m, t, 0.0)                  # zero padding
                slabs.append(t.astype(jnp.bfloat16))
        # Rows ordered (dy*3+dx)*Cin + ci to match the weight layout.
        patch = jnp.concatenate(slabs, axis=0)                # (9*Cin, HW) bf16

        # Single MXU matmul: (Cout, 9*Cin) @ (9*Cin, H*W), f32 accumulation.
        acc = jnp.dot(w_ref[...], patch, preferred_element_type=jnp.float32)

        # Lane-dense store of the bf16 intermediate.
        conv_ref[0] = acc.astype(jnp.bfloat16)

        # One-pass BN partials fused with the conv sweep (f32 accumulation).
        s_sum = jnp.sum(acc, axis=1, keepdims=True)           # (Cout, 1)
        s_sq = jnp.sum(acc * acc, axis=1, keepdims=True)      # (Cout, 1)
        stats_ref[0] = jnp.concatenate([s_sum, s_sq], axis=1)  # (Cout, 2)

    return conv_stats_kernel


def bn_relu_kernel(c_ref, mean_ref, scale_ref, o_ref):
    """Normalize + ReLU, purely lane-aligned elementwise work.

    c_ref:  (1, Cout, H*W) bf16
    mean_ref / scale_ref: (Cout, 1) f32 (per-channel, broadcast along lanes)
    o_ref:  (1, Cout, H*W) f32
    """
    c = c_ref[0].astype(jnp.float32)
    o_ref[0] = jnp.maximum((c - mean_ref[...]) * scale_ref[...], 0.0)


def basic_conv_block(x_nchw, weight):
    """x_nchw: (B, Cin, H, W) float32; weight: (Cout, Cin, 3, 3) float32."""
    B, Cin, H, W = x_nchw.shape
    Cout = weight.shape[0]
    HW = H * W

    # Free row-major reshape + bf16 cast; no padding, layout stays NCHW.
    x_flat = x_nchw.reshape(B, Cin, HW).astype(jnp.bfloat16)

    # (Cout, Cin, 3, 3) -> (Cout, 3, 3, Cin) -> (Cout, 9*Cin): row index
    # (dy*3+dx)*Cin + ci matches the in-kernel patch row order.
    w2 = jnp.transpose(weight, (0, 2, 3, 1)).reshape(Cout, 9 * Cin)
    w2 = w2.astype(jnp.bfloat16)

    # ---- Pass 1: conv + per-image BN partial stats (grid over batch) -------
    conv, stats = pl.pallas_call(
        _make_conv_stats_kernel(Cin, Cout, H, W),
        grid=(B,),
        in_specs=[
            pl.BlockSpec((1, Cin, HW), lambda b: (b, 0, 0)),
            pl.BlockSpec((Cout, 9 * Cin), lambda b: (0, 0)),
        ],
        out_specs=(
            pl.BlockSpec((1, Cout, HW), lambda b: (b, 0, 0)),
            pl.BlockSpec((1, Cout, 2), lambda b: (b, 0, 0)),
        ),
        out_shape=(
            jax.ShapeDtypeStruct((B, Cout, HW), jnp.bfloat16),
            jax.ShapeDtypeStruct((B, Cout, 2), jnp.float32),
        ),
        compiler_params=pltpu.CompilerParams(
            dimension_semantics=("parallel",)),
    )(x_flat, w2)

    # ---- Finalize global BatchNorm stats over (N, H, W) (tiny tensor) ------
    n = B * HW
    mean = jnp.sum(stats[:, :, 0], axis=0) / n                 # (Cout,)
    var = jnp.sum(stats[:, :, 1], axis=0) / n - mean * mean    # biased var
    scale = jax.lax.rsqrt(var + EPS)                           # (Cout,)

    # ---- Pass 2: normalize + ReLU (grid over batch, lane-dense) ------------
    out = pl.pallas_call(
        bn_relu_kernel,
        grid=(B,),
        in_specs=[
            pl.BlockSpec((1, Cout, HW), lambda b: (b, 0, 0)),
            pl.BlockSpec((Cout, 1), lambda b: (0, 0)),
            pl.BlockSpec((Cout, 1), lambda b: (0, 0)),
        ],
        out_specs=pl.BlockSpec((1, Cout, HW), lambda b: (b, 0, 0)),
        out_shape=jax.ShapeDtypeStruct((B, Cout, HW), jnp.float32),
        compiler_params=pltpu.CompilerParams(
            dimension_semantics=("parallel",)),
    )(conv, mean.reshape(Cout, 1), scale.reshape(Cout, 1))

    # Row-major reshape only -- no data movement -- back to NCHW like PyTorch.
    return out.reshape(B, Cout, H, W)


def _reference(x_nchw, weight):
    """Pure-JAX f32 reference for correctness checking."""
    conv = jax.lax.conv_general_dilated(
        x_nchw, weight, window_strides=(1, 1), padding=((1, 1), (1, 1)),
        dimension_numbers=("NCHW", "OIHW", "NCHW"))
    mean = jnp.mean(conv, axis=(0, 2, 3), keepdims=True)
    var = jnp.mean((conv - mean) ** 2, axis=(0, 2, 3), keepdims=True)
    return jnp.maximum((conv - mean) * jax.lax.rsqrt(var + EPS), 0.0)


if __name__ == "__main__":
    key = jax.random.PRNGKey(0)
    kx, kw = jax.random.split(key)

    B, Cin, Cout, H, W = 2, 4, 8, 16, 16
    x = jax.random.normal(kx, (B, Cin, H, W), dtype=jnp.float32)
    weight = jax.random.normal(kw, (Cout, Cin, 3, 3), dtype=jnp.float32) * 0.1

    out = jax.block_until_ready(basic_conv_block(x, weight))
    ref = jax.block_until_ready(_reference(x, weight))

    assert out.shape == (B, Cout, H, W)
    # bf16 MXU operands + bf16 intermediate -> relaxed tolerance vs f32 ref.
    assert jnp.allclose(out, ref, atol=5e-2, rtol=5e-2)
    print("KERNEL_OK")
</pallas_src>

<mosaic_0001>
module attributes {stable_mosaic.version = 11 : i64} {
  func.func @conv_stats_kernel(%arg0: i32, %arg1: memref<1x4x256xbf16, #tpu.memory_space<vmem>>, %arg2: memref<8x36xbf16, #tpu.memory_space<vmem>>, %arg3: memref<1x8x256xbf16, #tpu.memory_space<vmem>>, %arg4: memref<1x8x2xf32, #tpu.memory_space<vmem>>) attributes {dimension_semantics = [#tpu.dimension_semantics<parallel>], iteration_bounds = array<i64: 2>, scalar_prefetch = 0 : i64, scratch_operands = 0 : i64, tpu.core_type = #tpu.core_type<tc>, window_params = [{transform_indices = @transform_0, window_bounds = array<i64: 1, 4, 256>}, {pipeline_mode = #tpu.pipeline_mode<synchronous>, transform_indices = @transform_1, window_bounds = array<i64: 8, 36>}, {transform_indices = @transform_2, window_bounds = array<i64: 1, 8, 256>}, {transform_indices = @transform_3, window_bounds = array<i64: 1, 8, 2>}]} {
    %c0 = arith.constant 0 : index
    %c0_0 = arith.constant 0 : index
    %c0_1 = arith.constant 0 : index
    %0 = vector.load %arg1[%c0, %c0_0, %c0_1] : memref<1x4x256xbf16, #tpu.memory_space<vmem>>, vector<1x4x256xbf16>
    %1 = vector.shape_cast %0 : vector<1x4x256xbf16> to vector<4x256xbf16>
    %2 = arith.extf %1 : vector<4x256xbf16> to vector<4x256xf32>
    %3 = tpu.iota {dimensions = array<i32: 1>} : vector<1x256xi32>
    %c15_i32 = arith.constant 15 : i32
    %4 = vector.broadcast %c15_i32 : i32 to vector<1x256xi32>
    %5 = arith.andi %3, %4 : vector<1x256xi32>
    %c16_i32 = arith.constant 16 : i32
    %6 = vector.broadcast %c16_i32 : i32 to vector<1x256xi32>
    %7 = arith.cmpi sge, %3, %6 : vector<1x256xi32>
    %c240_i32 = arith.constant 240 : i32
    %8 = vector.broadcast %c240_i32 : i32 to vector<1x256xi32>
    %9 = arith.cmpi slt, %3, %8 : vector<1x256xi32>
    %c1_i32 = arith.constant 1 : i32
    %10 = vector.broadcast %c1_i32 : i32 to vector<1x256xi32>
    %11 = arith.cmpi sge, %5, %10 : vector<1x256xi32>
    %c14_i32 = arith.constant 14 : i32
    %12 = vector.broadcast %c14_i32 : i32 to vector<1x256xi32>
    %13 = arith.cmpi sle, %5, %12 : vector<1x256xi32>
    %c17_i32 = arith.constant 17 : i32
    %14 = tpu.dynamic_rotate %2 by %c17_i32 dim 1 : vector<4x256xf32>, i32 -> vector<4x256xf32>
    %15 = arith.andi %7, %11 : vector<1x256xi1>
    %cst = arith.constant 0.000000e+00 : f32
    %16 = vector.shape_cast %15 : vector<1x256xi1> to vector<1x256xi1>
    %17 = vector.broadcast %16 : vector<1x256xi1> to vector<4x256xi1>
    %18 = vector.broadcast %cst : f32 to vector<4x256xf32>
    %19 = arith.select %17, %14, %18 : vector<4x256xi1>, vector<4x256xf32>
    %20 = arith.truncf %19 : vector<4x256xf32> to vector<4x256xbf16>
    %c16_i32_2 = arith.constant 16 : i32
    %21 = tpu.dynamic_rotate %2 by %c16_i32_2 dim 1 : vector<4x256xf32>, i32 -> vector<4x256xf32>
    %cst_3 = arith.constant 0.000000e+00 : f32
    %22 = vector.shape_cast %7 : vector<1x256xi1> to vector<1x256xi1>
    %23 = vector.broadcast %22 : vector<1x256xi1> to vector<4x256xi1>
    %24 = vector.broadcast %cst_3 : f32 to vector<4x256xf32>
    %25 = arith.select %23, %21, %24 : vector<4x256xi1>, vector<4x256xf32>
    %26 = arith.truncf %25 : vector<4x256xf32> to vector<4x256xbf16>
    %c15_i32_4 = arith.constant 15 : i32
    %27 = tpu.dynamic_rotate %2 by %c15_i32_4 dim 1 : vector<4x256xf32>, i32 -> vector<4x256xf32>
    %28 = arith.andi %7, %13 : vector<1x256xi1>
    %cst_5 = arith.constant 0.000000e+00 : f32
    %29 = vector.shape_cast %28 : vector<1x256xi1> to vector<1x256xi1>
    %30 = vector.broadcast %29 : vector<1x256xi1> to vector<4x256xi1>
    %31 = vector.broadcast %cst_5 : f32 to vector<4x256xf32>
    %32 = arith.select %30, %27, %31 : vector<4x256xi1>, vector<4x256xf32>
    %33 = arith.truncf %32 : vector<4x256xf32> to vector<4x256xbf16>
    %c1_i32_6 = arith.constant 1 : i32
    %34 = tpu.dynamic_rotate %2 by %c1_i32_6 dim 1 : vector<4x256xf32>, i32 -> vector<4x256xf32>
    %cst_7 = arith.constant 0.000000e+00 : f32
    %35 = vector.shape_cast %11 : vector<1x256xi1> to vector<1x256xi1>
    %36 = vector.broadcast %35 : vector<1x256xi1> to vector<4x256xi1>
    %37 = vector.broadcast %cst_7 : f32 to vector<4x256xf32>
    %38 = arith.select %36, %34, %37 : vector<4x256xi1>, vector<4x256xf32>
    %39 = arith.truncf %38 : vector<4x256xf32> to vector<4x256xbf16>
    %40 = arith.truncf %2 : vector<4x256xf32> to vector<4x256xbf16>
    %c255_i32 = arith.constant 255 : i32
    %41 = tpu.dynamic_rotate %2 by %c255_i32 dim 1 : vector<4x256xf32>, i32 -> vector<4x256xf32>
    %cst_8 = arith.constant 0.000000e+00 : f32
    %42 = vector.shape_cast %13 : vector<1x256xi1> to vector<1x256xi1>
    %43 = vector.broadcast %42 : vector<1x256xi1> to vector<4x256xi1>
    %44 = vector.broadcast %cst_8 : f32 to vector<4x256xf32>
    %45 = arith.select %43, %41, %44 : vector<4x256xi1>, vector<4x256xf32>
    %46 = arith.truncf %45 : vector<4x256xf32> to vector<4x256xbf16>
    %c241_i32 = arith.constant 241 : i32
    %47 = tpu.dynamic_rotate %2 by %c241_i32 dim 1 : vector<4x256xf32>, i32 -> vector<4x256xf32>
    %48 = arith.andi %9, %11 : vector<1x256xi1>
    %cst_9 = arith.constant 0.000000e+00 : f32
    %49 = vector.shape_cast %48 : vector<1x256xi1> to vector<1x256xi1>
    %50 = vector.broadcast %49 : vector<1x256xi1> to vector<4x256xi1>
    %51 = vector.broadcast %cst_9 : f32 to vector<4x256xf32>
    %52 = arith.select %50, %47, %51 : vector<4x256xi1>, vector<4x256xf32>
    %53 = arith.truncf %52 : vector<4x256xf32> to vector<4x256xbf16>
    %c240_i32_10 = arith.constant 240 : i32
    %54 = tpu.dynamic_rotate %2 by %c240_i32_10 dim 1 : vector<4x256xf32>, i32 -> vector<4x256xf32>
    %cst_11 = arith.constant 0.000000e+00 : f32
    %55 = vector.shape_cast %9 : vector<1x256xi1> to vector<1x256xi1>
    %56 = vector.broadcast %55 : vector<1x256xi1> to vector<4x256xi1>
    %57 = vector.broadcast %cst_11 : f32 to vector<4x256xf32>
    %58 = arith.select %56, %54, %57 : vector<4x256xi1>, vector<4x256xf32>
    %59 = arith.truncf %58 : vector<4x256xf32> to vector<4x256xbf16>
    %c239_i32 = arith.constant 239 : i32
    %60 = tpu.dynamic_rotate %2 by %c239_i32 dim 1 : vector<4x256xf32>, i32 -> vector<4x256xf32>
    %61 = arith.andi %9, %13 : vector<1x256xi1>
    %cst_12 = arith.constant 0.000000e+00 : f32
    %62 = vector.shape_cast %61 : vector<1x256xi1> to vector<1x256xi1>
    %63 = vector.broadcast %62 : vector<1x256xi1> to vector<4x256xi1>
    %64 = vector.broadcast %cst_12 : f32 to vector<4x256xf32>
    %65 = arith.select %63, %60, %64 : vector<4x256xi1>, vector<4x256xf32>
    %66 = arith.truncf %65 : vector<4x256xf32> to vector<4x256xbf16>
    %67 = tpu.concatenate %20, %26, %33, %39, %40, %46, %53, %59, %66 in 0 : vector<4x256xbf16>, vector<4x256xbf16>, vector<4x256xbf16>, vector<4x256xbf16>, vector<4x256xbf16>, vector<4x256xbf16>, vector<4x256xbf16>, vector<4x256xbf16>, vector<4x256xbf16> -> vector<36x256xbf16>
    %c0_13 = arith.constant 0 : index
    %c0_14 = arith.constant 0 : index
    %68 = vector.load %arg2[%c0_13, %c0_14] : memref<8x36xbf16, #tpu.memory_space<vmem>>, vector<8x36xbf16>
    %cst_15 = arith.constant dense<0.000000e+00> : vector<8x256xf32>
    %69 = tpu.matmul %68, %67, %cst_15 {dimension_numbers = #tpu.dot_dimension_numbers<[1], [0], [0], [1], [0, 0, 1, 1], [], []>} : vector<8x36xbf16>, vector<36x256xbf16>, vector<8x256xf32> -> vector<8x256xf32>
    %70 = arith.truncf %69 : vector<8x256xf32> to vector<8x256xbf16>
    %c0_16 = arith.constant 0 : index
    %c0_17 = arith.constant 0 : index
    %c0_18 = arith.constant 0 : index
    %71 = vector.load %arg3[%c0_16, %c0_17, %c0_18] : memref<1x8x256xbf16, #tpu.memory_space<vmem>>, vector<1x8x256xbf16>
    %72 = vector.shape_cast %71 : vector<1x8x256xbf16> to vector<8x256xbf16>
    %73 = vector.shape_cast %70 : vector<8x256xbf16> to vector<1x8x256xbf16>
    tpu.vector_store %arg3[%c0_16, %c0_17, %c0_18], %73 {strides = array<i32>} : memref<1x8x256xbf16, #tpu.memory_space<vmem>>, vector<1x8x256xbf16>,
    %cst_19 = arith.constant dense<0.000000e+00> : vector<8xf32>
    %74 = vector.multi_reduction <add>, %69, %cst_19 [1] : vector<8x256xf32> to vector<8xf32>
    %75 = vector.shape_cast %74 : vector<8xf32> to vector<8x1xf32>
    %76 = arith.mulf %69, %69 : vector<8x256xf32>
    %cst_20 = arith.constant dense<0.000000e+00> : vector<8xf32>
    %77 = vector.multi_reduction <add>, %76, %cst_20 [1] : vector<8x256xf32> to vector<8xf32>
    %78 = vector.shape_cast %77 : vector<8xf32> to vector<8x1xf32>
    %79 = tpu.concatenate %75, %78 in 1 : vector<8x1xf32>, vector<8x1xf32> -> vector<8x2xf32>
    %c0_21 = arith.constant 0 : index
    %c0_22 = arith.constant 0 : index
    %c0_23 = arith.constant 0 : index
    %80 = vector.load %arg4[%c0_21, %c0_22, %c0_23] : memref<1x8x2xf32, #tpu.memory_space<vmem>>, vector<1x8x2xf32>
    %81 = vector.shape_cast %80 : vector<1x8x2xf32> to vector<8x2xf32>
    %82 = vector.shape_cast %79 : vector<8x2xf32> to vector<1x8x2xf32>
    tpu.vector_store %arg4[%c0_21, %c0_22, %c0_23], %82 {strides = array<i32>} : memref<1x8x2xf32, #tpu.memory_space<vmem>>, vector<1x8x2xf32>,
    return
  }
  func.func @transform_0(%arg0: i32) -> (i32, i32, i32) {
    %c0_i32 = arith.constant 0 : i32
    %c0_i32_0 = arith.constant 0 : i32
    %c0_i32_1 = arith.constant 0 : i32
    return %arg0, %c0_i32, %c0_i32_0 : i32, i32, i32
  }
  func.func @transform_1(%arg0: i32) -> (i32, i32) {
    %c0_i32 = arith.constant 0 : i32
    %c0_i32_0 = arith.constant 0 : i32
    %c0_i32_1 = arith.constant 0 : i32
    return %c0_i32, %c0_i32_0 : i32, i32
  }
  func.func @transform_2(%arg0: i32) -> (i32, i32, i32) {
    %c0_i32 = arith.constant 0 : i32
    %c0_i32_0 = arith.constant 0 : i32
    %c0_i32_1 = arith.constant 0 : i32
    return %arg0, %c0_i32, %c0_i32_0 : i32, i32, i32
  }
  func.func @transform_3(%arg0: i32) -> (i32, i32, i32) {
    %c0_i32 = arith.constant 0 : i32
    %c0_i32_0 = arith.constant 0 : i32
    %c0_i32_1 = arith.constant 0 : i32
    return %arg0, %c0_i32, %c0_i32_0 : i32, i32, i32
  }
}

</mosaic_0001>

<bundles_post_ra>
// kernel: tpu_custom_call.1
= control target key start
LH: loop header
LB: loop body
LE: loop exit
PB: predicated region body
PF: predicated region fallthrough
CT: control target
= control target key end

     0   :  { %9 = vsyncpa [#allocation3], 0  ;;  %s1216_s0 = inlined_call_operand.hbm [shape: bf16[2,4,256], index: 0, kind: input, shape index: {}]   ;;  %s1217_s1 = inlined_call_operand.hbm [shape: bf16[8,36], index: 1, kind: input, shape index: {}]   ;;  %s1218_s2 = inlined_call_operand.hbm [shape: bf16[2,8,256], index: 2, kind: output, shape index: {0}]   ;;  %s1219_s3 = inlined_call_operand.vmem [shape: f32[2,8,2], index: 3, kind: output, shape index: {1}]  }
   0x1   :  { %11 = vsyncpa [#allocation3 + $0x1], 0 }
   0x2   :  { %12 = vsyncpa [#allocation6], 0 }
   0x3   :  { %13 = vsyncpa [#allocation4], 0 }
   0x4   :  { %15 = vsyncpa [#allocation4 + $0x1], 0  ;;  %s943_s12 = smov 0   ;;  %s945_s13 = smov 0  }
   0x5   :  { %s947_s14 = smov 0   ;;  %s949_s15 = smov 0  }
   0x6 LB: > { %s964_s16 = sadd.s32 4294967295, %s912_s15   ;;  %s656_s17 = sadd.s32 4294967294, %s912_s15   ;;  %s912_s15 = sphi %s949_s15, %s1245_s15   ;;  %s908_s14 = sphi %s947_s14, %s1244_s14   ;;  %s904_s13 = sphi %s945_s13, %s1243_s13   ;;  %s900_s12 = sphi %s943_s12, %s1242_s12  }
   0x7   : > { %p41_p0 = scmp.ne.s32.totalorder %s904_s13, %s900_s12  ;;  %p42_p1 = scmp.eq.s32.totalorder %s964_s16, 0 }
   0x8   : > { %p86_p2 = scmp.eq.s32.totalorder %s964_s16, 1  ;;  %p92_p3 = scmp.eq.s32.totalorder %s656_s17, 1 }
   0x9   : > { %p973_p4 = por %p42_p1, %p41_p0  ;;  %p657_p5 = scmp.ge.s32.totalorder %s912_s15, 1 }
   0xa   : > { %p978_p6 = por %p92_p3, %p41_p0  ;;  %p125_p7 = scmp.lt.s32.totalorder %s912_s15, 3 }
   0xb   : > { %s137_s22 = sshll.u32 %s1217_s1, 4  ;;  %s914_s24 = smov [#allocation5]   ;;  %s138_s22 = int_to_ptr.hbm [resolvable:$true] %s137_s22 }
   0xc   : > { %p986_p8 = pnand %p657_p5, %p125_p7  ;;  %s139_s25 = sshll.u32 %s914_s24, 4  ;;  %s140_s25 = int_to_ptr.vmem [resolvable:$true] %s139_s25 }
   0xd   : > { %s996_s26 = sadd.s32 1, %s912_s15   ;;  %s28_s27 = sadd.s32 1, %s908_s14 }
   0xe   : > { %p685_p10 = pneg %p986_p8  ;;  %s25_s28 = ssub.s32 %s912_s15, %s996_s26 }
   0xf   : > { %p26_p12 = scmp.eq.s32.totalorder %s25_s28, 0  ;;  %p35_p13 = scmp.ne.s32.totalorder %s908_s14, %s904_s13 }
  0x10   : > { %p686_p11 = pnand %p685_p10, %p42_p1  ;;  %p36_p0 = scmp.eq.s32.totalorder %s912_s15, 0 }
  0x11   : > { %s1005_s29 = scalar_select %p26_p12, %s908_s14, %s28_s27  }
  0x12   : > { %688 = dma.hbm_to_vmem [thread:$0]  (!%p686_p11), %s138_s22, 64, %s140_s25, [#allocation6]  }
  0x13   : > { %p1009_p3 = por %p86_p2, %p35_p13  ;;  %p698_p5 = scmp.lt.s32.totalorder %s912_s15, 2 }
  0x14   : > { %s150_s4 = sand.u32 1, %s908_s14   ;;  %s675_s5 = sshll.u32 %s912_s15, 2 }
  0x15   : > { %p37_p7 = por %p36_p0, %p35_p13  ;;  %s660_s6 = sshll.u32 %s150_s4, 2 }
  0x16   : > { %s159_s9 = scalar_lea.hbm %s1216_s0, %s675_s5  ;;  %s154_s11 = scalar_lea.vmem [#allocation2], %s660_s6 }
  0x17   : > { %s161_s10 = sshll.u32 %s159_s9, 4  ;;  %s163_s17 = sshll.u32 %s154_s11, 4  ;;  %s162_s10 = int_to_ptr.hbm [resolvable:$true] %s161_s10  ;;  %s164_s17 = int_to_ptr.vmem [resolvable:$true] %s163_s17 }
  0x18   : > { %p1019_p10 = pnand %p698_p5, %p37_p7  ;;  %s151_s21 = scalar_lea.sflag [#allocation3], %s150_s4 }
  0x19   : > { %s812_s22 = sshra.s32 %s162_s10, 4  ;;  %s819_s28 = scalar_lea.hbm %s1216_s0, 8  ;;  %s813_s22 = int_to_ptr.hbm [resolvable:$true] %s812_s22 }
  0x1a   : > { %s814_s24 = scalar_lea.hbm %s813_s22, 4  ;;  %p816_p11 = pneg %p1019_p10 }
  0x1b   : > { %p815_p2 = scmp.ne.s32.totalorder %s813_s22, %s814_s24  ;;  %p820_p0 = scmp.lt.s32.totalorder %s813_s22, %s1216_s0 }
  0x1c   : > { %p821_p5 = scmp.lt.s32.totalorder %s819_s28, %s814_s24 }
  0x1d   : > { %p817_p12 = pnand %p816_p11, %p815_p2 }
  0x1e   : > { %p822_p7 = por %p821_p5, %p820_p0 }
  0x1f   : > { %p818_p13 = pneg %p817_p12 }
  0x21   : > { %p823_p9 = pnand %p822_p7, %p818_p13 }
  0x23   : > { %826 = shalt.err (!%p823_p9)
}
  0x24   : > { %692 = dma.hbm_to_vmem [thread:$0]  (!%p1019_p10), %s162_s10, 64, %s164_s17, %s151_s21  }
  0x25   : > { %172 = sbr.rel (%p986_p8) target bundleno = 501 (0x1f5), region = 28  ;;  %s1036_s4 = sand.u32 (!%p986_p8), 1, %s904_s13  }
  0x26   : > { %s664_s7 = sshll.u32 (!%p986_p8), %s1036_s4, 2  ;;  %s175_s8 = scalar_lea.sflag (!%p986_p8), [#allocation3], %s1036_s4 }
  0x27   : > { %s178_s9 = scalar_lea.vmem (!%p986_p8), [#allocation2], %s664_s7 }
  0x2a   : > { %887 = dma.done.wait (%p973_p4), %s175_s8, 64  }
  0x2b   : > { %889 = vsyncadd (%p973_p4), %s175_s8, 4294967232 }
  0x2c   : > { %891 = dma.done.wait (%p42_p1), [#allocation6], 64  }
  0x2d   : > { %893 = vsyncadd (%p42_p1), [#allocation6], 4294967232  ;;  %v216_v0 = vld [vmem:[%s178_s9] sm:$0xf]  ;;  %s915_s18 = smov 127   ;;  %s916_s23 = smov 16   ;;  %v218_v26 = vlaneseq }
  0x2e   : > { %v217_v1 = vunpack.c.l.bf16 %v216_v0  ;;  %s917_s10 = smov 113   ;;  %s918_s11 = smov 17   ;;  %vm444_vm15 = vcmask 1041408  }
  0x2f   : > { %s919_s17 = smov 112   ;;  %s920_s20 = smov 111   ;;  %v1048_v27 = vand.u32 127, %v218_v26 }
  0x30   : > { %232 = vst [vmem:[#allocation1] ss:$2 sm:$0xff] %v217_v1  ;;  %s921_s21 = smov 15   ;;  %s922_s22 = smov 1  }
  0x31   : > { %v1051_v28 = vadd.s32 128, %v1048_v27  ;;  %v221_v31 = vand.u32 15, %v1048_v27  ;;  %vm321_vm0 = vcmp.lt.s32.totalorder %v1048_v27, 127  ;;  %vm262_vm1 = vcmp.lt.s32.totalorder %v1048_v27, 16  ;;  %s676_s24 = sshll.u32 %s964_s16, 3  ;;  %s666_s25 = sshll.u32 %s1036_s4, 3 }
  0x32   : > { %vm223_vm4 = vcmp.ge.s32.totalorder %v1048_v27, 16  ;;  %vm340_vm7 = vcmp.lt.s32.totalorder %v1048_v27, 113  ;;  %vm361_vm9 = vcmp.lt.s32.totalorder %v1048_v27, 112  ;;  %vm241_vm10 = vcmp.lt.s32.totalorder %v1048_v27, 17  ;;  %s544_s5 = scalar_lea.hbm %s1218_s2, %s676_s24  ;;  %s204_s6 = scalar_lea.vmem [#allocation7], %s666_s25 }
  0x33   : > { %v222_v32 = vand.u32 15, %v1051_v28  ;;  %vm1057_vm2 = vcmp.le.s32.totalorder %v221_v31, 14  ;;  %vm226_vm5 = vcmp.lt.s32.totalorder %v1051_v28, 240  ;;  %vm1078_vm8 = vcmp.ge.s32.totalorder %v221_v31, 1  ;;  %s546_s7 = sshll.u32 %s204_s6, 4  ;;  %s548_s8 = sshll.u32 %s544_s5, 4  ;;  %s547_s7 = int_to_ptr.vmem [resolvable:$true] %s546_s7  ;;  %s549_s8 = int_to_ptr.hbm [resolvable:$true] %s548_s8 }
  0x34   : > { %vm1096_vm12 = vmand %vm223_vm4, %vm1078_vm8  ;;  %vm281_vm13 = vcmp.lt.s32.totalorder %v1048_v27, 15  ;;  %vm380_vm14 = vcmp.lt.s32.totalorder %v1048_v27, 111  ;;  %s529_s9 = scalar_lea.sflag [#allocation4], %s1036_s4 }
  0x35   : > { %vm1061_vm3 = vcmp.le.s32.totalorder %v222_v32, 14  ;;  %vm1073_vm6 = vcmp.ge.s32.totalorder %v222_v32, 1 }
  0x36   : > { %vm1088_vm11 = vmand %vm226_vm5, %vm1073_vm6 }
  0x37   : > { %v233_v2 = vld.sshfl [vmem:[#allocation1] sm:$0xff pattern:$0x75316420]  ;;  %v234_v3 = vld.sshfl [vmem:[#allocation1 + $0x8] sm:$0xff pattern:$0x75316420] }
  0x38   : > { %253 = vst [vmem:[#allocation1] ss:$2 sm:$0xff] %v217_v1  ;;  %v747_v17 = vpack.i.bf16 %v234_v3, %v233_v2 }
  0x3f   : > { %v254_v4 = vld.sshfl [vmem:[#allocation1] sm:$0xff pattern:$0x75316420]  ;;  %v255_v5 = vld.sshfl [vmem:[#allocation1 + $0x8] sm:$0xff pattern:$0x75316420] }
  0x40   : > { %272 = vst [vmem:[#allocation1] ss:$2 sm:$0xff] %v217_v1  ;;  %v742_v13 = vpack.i.bf16 %v255_v5, %v254_v4 }
  0x42   : > { %743 = vrot.lane.b32.xlu2 %v742_v13, %s916_s23 }
  0x47   : > { %v273_v6 = vld.sshfl [vmem:[#allocation1] sm:$0xff pattern:$0x75316420]  ;;  %v274_v7 = vld.sshfl [vmem:[#allocation1 + $0x8] sm:$0xff pattern:$0x75316420] }
  0x48   : > { %293 = vst [vmem:[#allocation1] ss:$2 sm:$0xff] %v217_v1  ;;  %v777_v21 = vpack.i.bf16 %v274_v7, %v273_v6 }
  0x4a   : > { %748 = vrot.lane.b32.xlu2 %v747_v17, %s918_s11 }
  0x4f   : > { %v294_v8 = vld.sshfl [vmem:[#allocation1] sm:$0xff pattern:$0x75316420]  ;;  %v295_v9 = vld.sshfl [vmem:[#allocation1 + $0x8] sm:$0xff pattern:$0x75316420] }
  0x50   : > { %312 = vst [vmem:[#allocation1] ss:$2 sm:$0xff] %v217_v1  ;;  %v772_v25 = vpack.i.bf16 %v295_v9, %v294_v8 }
  0x57   : > { %v313_v10 = vld.sshfl [vmem:[#allocation1] sm:$0xff pattern:$0x75316420]  ;;  %v314_v11 = vld.sshfl [vmem:[#allocation1 + $0x8] sm:$0xff pattern:$0x75316420] }
  0x58   : > { %331 = vst [vmem:[#allocation1] ss:$2 sm:$0xff] %v217_v1  ;;  %v752_v12 = vpack.i.bf16 %v314_v11, %v313_v10 }
  0x5a   : > { %753 = vrot.lane.b32.xlu0 %v752_v12, %s915_s18  ;;  %s856_s18 = sshra.s32 %s549_s8, 4  ;;  %s857_s18 = int_to_ptr.hbm [resolvable:$true] %s856_s18 }
  0x5b   : > { %s858_s23 = scalar_lea.hbm %s857_s18, 8  ;;  %p863_p9 = scmp.lt.s32.totalorder %s857_s18, %s1218_s2 }
  0x5c   : > { %p859_p1 = scmp.ne.s32.totalorder %s857_s18, %s858_s23 }
  0x5e   : > { %p860_p4 = pnand %p859_p1, %p1009_p3 }
  0x5f   : > { %v332_v14 = vld.sshfl [vmem:[#allocation1] sm:$0xff pattern:$0x75316420]  ;;  %v333_v15 = vld.sshfl [vmem:[#allocation1 + $0x8] sm:$0xff pattern:$0x75316420] }
  0x60   : > { %v757_v16 = vpack.i.bf16 %v333_v15, %v332_v14  ;;  %352 = vst [vmem:[#allocation1] ss:$2 sm:$0xff] %v217_v1  ;;  %p861_p8 = pneg %p860_p4 }
  0x62   : > { %758 = vrot.lane.b32.xlu1 %v757_v16, %s917_s10 }
  0x67   : > { %v353_v18 = vld.sshfl [vmem:[#allocation1] sm:$0xff pattern:$0x75316420]  ;;  %v354_v19 = vld.sshfl [vmem:[#allocation1 + $0x8] sm:$0xff pattern:$0x75316420] }
  0x68   : > { %v762_v20 = vpack.i.bf16 %v354_v19, %v353_v18  ;;  %371 = vst [vmem:[#allocation1] ss:$2 sm:$0xff] %v217_v1 }
  0x6a   : > { %763 = vrot.lane.b32.xlu1 %v762_v20, %s919_s17  ;;  %s862_s17 = scalar_lea.hbm %s1218_s2, 16 }
  0x6b   : > { %p864_p10 = scmp.lt.s32.totalorder %s862_s17, %s858_s23 }
  0x6d   : > { %p865_p2 = por %p864_p10, %p863_p9 }
  0x6f   : > { %v372_v22 = vld.sshfl [vmem:[#allocation1] sm:$0xff pattern:$0x75316420]  ;;  %v373_v23 = vld.sshfl [vmem:[#allocation1 + $0x8] sm:$0xff pattern:$0x75316420]  ;;  %p866_p11 = pnand %p865_p2, %p861_p8 }
  0x70   : > { %v767_v24 = vpack.i.bf16 %v373_v23, %v372_v22  ;;  %417 = vst [vmem:[#allocation1] ss:$4 sm:$0xff] %v216_v0 }
  0x72   : > { %768 = vrot.lane.b32.xlu0 %v767_v24, %s920_s20  ;;  %778 = vrot.lane.b32.xlu1 %v777_v21, %s921_s21 }
  0x7a   : > { %773 = vrot.lane.b32.xlu0 %v772_v25, %s922_s22 }
  0x9c   : > { %v744_v30 = vpop.permute.xlu2 %743 }
  0x9d   : > { %v746_v35 = vunpack.i.h.bf16 %v744_v30  ;;  %v745_v36 = vunpack.i.l.bf16 %v744_v30 }
  0x9f   : > { %v264_v42 = vsel %vm262_vm1, %v746_v35, %v745_v36  ;;  %v263_v45 = vsel %vm262_vm1, %v745_v36, %v746_v35  ;;  %vm1132_vm1 = vmand %vm223_vm4, %vm1057_vm2 }
  0xa0   : > { %v269_v46 = vsel %vm223_vm4, %v264_v42, 0.0  ;;  %vm302_vm4 = vcmp.lt.s32.totalorder %v1048_v27, 1 }
  0xa1   : > { %v271_v52 = vpack.c.bf16 %v263_v45, %v269_v46 }
  0xa3   : > { %v398_v0 = vunpack.c.l.b16 %v271_v52  ;;  %v399_v9 = vunpack.c.h.b16 %v271_v52 }
  0xa4   : > { %v749_v47 = vpop.permute.xlu2 %748 }
  0xa5   : > { %v751_v53 = vunpack.i.h.bf16 %v749_v47  ;;  %v750_v54 = vunpack.i.l.bf16 %v749_v47  ;;  %v1114_v16 = vpack.c.b16 %v398_v0, %v398_v0  ;;  %v1118_v17 = vpack.c.b16 %v399_v9, %v399_v9 }
  0xa7   : > { %v242_v2 = vsel %vm241_vm10, %v750_v54, %v751_v53  ;;  %v243_v3 = vsel %vm241_vm10, %v751_v53, %v750_v54  ;;  %v403_v27 = vrot.slane %v1118_v17, 6 }
  0xa8   : > { %v250_v12 = vsel %vm1096_vm12, %v243_v3, 0.0  ;;  %v251_v13 = vsel %vm1073_vm6, %v242_v2, 0.0 }
  0xa9   : > { %v252_v19 = vpack.c.bf16 %v251_v13, %v250_v12  ;;  %v402_v13 = vrot.slane %v1114_v16, 6 }
  0xcc   : > { %v754_v29 = vpop.permute.xlu0 %753 }
  0xcd   : > { %v756_v33 = vunpack.i.h.bf16 %v754_v29  ;;  %v755_v34 = vunpack.i.l.bf16 %v754_v29 }
  0xcf   : > { %v322_v39 = vsel %vm321_vm0, %v755_v34, %v756_v33  ;;  %v323_v40 = vsel %vm321_vm0, %v756_v33, %v755_v34  ;;  %vm1124_vm0 = vmand %vm226_vm5, %vm1061_vm3 }
  0xd0   : > { %v328_v43 = vsel %vm1057_vm2, %v322_v39, 0.0  ;;  %v329_v44 = vsel %vm1061_vm3, %v323_v40, 0.0  ;;  %v418_v40 = vld.sshfl [vmem:[#allocation1] sm:$0xff pattern:$0x73625140] }
  0xd1   : > { %v330_v50 = vpack.c.bf16 %v329_v44, %v328_v43  ;;  %v419_v43 = vld.sshfl [vmem:[#allocation1 + $0x8] sm:$0xff pattern:$0x73625140]  ;;  %v393_v44 = vunpack.c.l.b16 %v252_v19 }
  0xd3   : > { %v421_v59 = vunpack.c.l.b16 %v330_v50  ;;  %v422_v60 = vunpack.c.h.b16 %v330_v50 }
  0xd4   : > { %v759_v41 = vpop.permute.xlu1 %758 }
  0xd5   : > { %v761_v48 = vunpack.i.h.bf16 %v759_v41  ;;  %v760_v49 = vunpack.i.l.bf16 %v759_v41  ;;  %v423_v10 = vpack.c.b16 %v421_v59, %v421_v59  ;;  %v424_v11 = vpack.c.b16 %v422_v60, %v422_v60 }
  0xd6   : > { %v395_v59 = vpack.c.b16 %v393_v44, %v393_v44  ;;  %v394_v60 = vunpack.c.h.b16 %v252_v19 }
  0xd7   : > { %v341_v57 = vsel %vm340_vm7, %v760_v49, %v761_v48  ;;  %v342_v58 = vsel %vm340_vm7, %v761_v48, %v760_v49  ;;  %v425_v21 = vrot.slane %v423_v10, 6  ;;  %v426_v22 = vrot.slane %v424_v11, 6 }
  0xd8   : > { %v349_v4 = vsel %vm1078_vm8, %v341_v57, 0.0  ;;  %v350_v5 = vsel %vm1088_vm11, %v342_v58, 0.0 }
  0xd9   : > { %v351_v14 = vpack.c.bf16 %v350_v5, %v349_v4  ;;  %v464_v54 = vsel %vm444_vm15, %v418_v40, %v425_v21  ;;  %v466_v56 = vsel %vm444_vm15, %v419_v43, %v426_v22  ;;  %v447_v22 = vsel %vm444_vm15, %v395_v59, %v402_v13 }
  0xdb   : > { %v428_v31 = vunpack.c.l.b16 %v351_v14  ;;  %v429_v33 = vunpack.c.h.b16 %v351_v14  ;;  %v396_v14 = vpack.c.b16 %v394_v60, %v394_v60 }
  0xdc   : > { %v764_v61 = vpop.permute.xlu1 %763 }
  0xdd   : > { %v766_v62 = vunpack.i.h.bf16 %v764_v61  ;;  %v765_v63 = vunpack.i.l.bf16 %v764_v61  ;;  %v430_v48 = vpack.c.b16 %v428_v31, %v428_v31  ;;  %v431_v50 = vpack.c.b16 %v429_v33, %v429_v33  ;;  %v477_v31 = vld [vmem:[#allocation5] sm:$0xf] }
  0xde   : > { %v450_v16 = vsel %vm444_vm15, %v396_v14, %v403_v27 }
  0xdf   : > { %v362_v6 = vsel %vm361_vm9, %v765_v63, %v766_v62  ;;  %v363_v7 = vsel %vm361_vm9, %v766_v62, %v765_v63 }
  0xe0   : > { %v369_v8 = vsel %vm226_vm5, %v363_v7, 0.0  ;;  %vm451_vm5 = vcmask 1043456  }
  0xe1   : > { %v370_v15 = vpack.c.bf16 %v369_v8, %v362_v6  ;;  %v468_v1 = vsel %vm451_vm5, %v464_v54, %v430_v48  ;;  %v470_v3 = vsel %vm451_vm5, %v466_v56, %v431_v50 }
  0xe3   : > { %v433_v32 = vunpack.c.l.b16 %v370_v15  ;;  %v434_v34 = vunpack.c.h.b16 %v370_v15 }
  0xe4   : > { %v769_v18 = vpop.permute.xlu0 %768  ;;  %v779_v20 = vpop.permute.xlu1 %778 }
  0xe5   : > { %v771_v23 = vunpack.i.h.bf16 %v769_v18  ;;  %v770_v24 = vunpack.i.l.bf16 %v769_v18  ;;  %v781_v25 = vunpack.i.h.bf16 %v779_v20  ;;  %v780_v26 = vunpack.i.l.bf16 %v779_v20 }
  0xe6   : > { %v435_v49 = vpack.c.b16 %v433_v32, %v433_v32  ;;  %v436_v52 = vpack.c.b16 %v434_v34, %v434_v34 }
  0xe7   : > { %v282_v35 = vsel %vm281_vm13, %v780_v26, %v781_v25  ;;  %v283_v28 = vsel %vm281_vm13, %v781_v25, %v780_v26  ;;  %v381_v36 = vsel %vm380_vm14, %v770_v24, %v771_v23  ;;  %v382_v39 = vsel %vm380_vm14, %v771_v23, %v770_v24 }
  0xe8   : > { %v389_v41 = vsel %vm1057_vm2, %v381_v36, 0.0  ;;  %v390_v42 = vsel %vm1124_vm0, %v382_v39, 0.0  ;;  %v290_v45 = vsel %vm1132_vm1, %v283_v28, 0.0  ;;  %v291_v46 = vsel %vm1061_vm3, %v282_v35, 0.0 }
  0xe9   : > { %v391_v47 = vpack.c.bf16 %v390_v42, %v389_v41  ;;  %v292_v57 = vpack.c.bf16 %v291_v46, %v290_v45  ;;  %vm456_vm2 = vcmask 1045504   ;;  %v437_v0 = vrot.slane %v435_v49, 2 }
  0xea   : > { %v438_v2 = vrot.slane %v436_v52, 2  ;;  %vm478_vm3 = vcmask 293888  }
  0xeb   : > { %v440_v53 = vunpack.c.l.b16 %v391_v47  ;;  %v441_v37 = vunpack.c.h.b16 %v391_v47  ;;  %v405_v10 = vunpack.c.l.b16 %v292_v57  ;;  %v406_v11 = vunpack.c.h.b16 %v292_v57 }
  0xec   : > { %v774_v58 = vpop.permute.xlu0 %773  ;;  %v472_v15 = vsel %vm456_vm2, %v468_v1, %v437_v0  ;;  %v475_v18 = vsel %vm456_vm2, %v470_v3, %v438_v2 }
  0xed   : > { %v776_v61 = vunpack.i.h.bf16 %v774_v58  ;;  %v775_v38 = vunpack.i.l.bf16 %v774_v58  ;;  %v442_v62 = vpack.c.b16 %v440_v53, %v440_v53  ;;  %v443_v63 = vpack.c.b16 %v441_v37, %v441_v37 }
  0xee   : > { %v407_v51 = vpack.c.b16 %v405_v10, %v405_v10  ;;  %v408_v20 = vpack.c.b16 %v406_v11, %v406_v11 }
  0xef   : > { %v303_v4 = vsel %vm302_vm4, %v775_v38, %v776_v61  ;;  %v304_v5 = vsel %vm302_vm4, %v776_v61, %v775_v38  ;;  %v483_v6 = vsel %vm444_vm15, %v442_v62, 0  ;;  %v486_v7 = vsel %vm444_vm15, %v443_v63, 0 }
  0xf0   : > { %v309_v8 = vsel %vm1078_vm8, %v304_v5, 0.0  ;;  %v310_v9 = vsel %vm1073_vm6, %v303_v4, 0.0  ;;  %493 = vmatpush.bf16.msra.mxu0 %v483_v6  ;;  %506 = vmatpush.bf16.msra.mxu1 %v486_v7  ;;  %v453_v25 = vsel %vm451_vm5, %v447_v22, %v407_v51  ;;  %v455_v26 = vsel %vm451_vm5, %v450_v16, %v408_v20 }
  0xf1   : > { %v311_v12 = vpack.c.bf16 %v310_v9, %v309_v8 }
  0xf3   : > { %v410_v19 = vunpack.c.l.b16 %v311_v12  ;;  %v411_v55 = vunpack.c.h.b16 %v311_v12 }
  0xf4   : > { %494 = vmatpush.bf16.msra.mxu0 %v472_v15  ;;  %507 = vmatpush.bf16.msra.mxu1 %v475_v18 }
  0xf5   : > { %v412_v21 = vpack.c.b16 %v410_v19, %v410_v19  ;;  %v413_v23 = vpack.c.b16 %v411_v55, %v411_v55 }
  0xf7   : > { %v414_v24 = vrot.slane %v412_v21, 2  ;;  %v415_v17 = vrot.slane %v413_v23, 2 }
  0xf9   : > { %v458_v29 = vsel %vm456_vm2, %v453_v25, %v414_v24  ;;  %v461_v30 = vsel %vm456_vm2, %v455_v26, %v415_v17 }
  0xfa   : > { %495 = vmatpush.bf16.msra.mxu0 %v458_v29  ;;  %508 = vmatpush.bf16.msra.mxu1 %v461_v30 }
  0xfd   : > { %668 = vmatmul.msk.bf16.vlgmr.msra.gmra.mxu0 %vm478_vm3, %v477_v31  ;;  %669 = vmatmul.msk.bf16.vlgmr.msra.gmra.mxu1 %vm478_vm3, %v477_v31 }
 0x17a   : > { %v497_v32 = vpop.f32.mrf.mxu0  ;;  %v510_v33 = vpop.f32.mrf.mxu1 }
 0x17b   : > { %v514_v34 = vpack.c.bf16 %v510_v33, %v497_v32  ;;  %v516_v35 = vadd.f32 %v510_v33, %v497_v32  ;;  %v519_v28 = vmul.f32 %v497_v32, %v497_v32  ;;  %v520_v36 = vmul.f32 %v510_v33, %v510_v33 }
 0x17d   : > { %517 = vadd.xlane.f32.xlu2 %v516_v35  ;;  %v521_v39 = vadd.f32 %v520_v36, %v519_v28  ;;  %515 = vst [vmem:[%s204_s6] sm:$0xff] %v514_v34 }
 0x17e   : > { %869 = shalt.err (!%p866_p11)
}
 0x17f   : > { %683 = dma.vmem_to_hbm [thread:$0]  (%p1009_p3), %s547_s7, 128, %s549_s8, %s529_s9   ;;  %522 = vadd.xlane.f32.xlu0 %v521_v39  ;;  %vm524_vm6 = vcmask 7168   ;;  %vm526_vm7 = vcmask 15360  }
 0x180   : > { %p211_p12 = scmp.lt.s32.totalorder %s964_s16, 1 }
 0x182   : > { %v499_v40 = vpop.f32.mrf.mxu0  ;;  %v512_v41 = vpop.f32.mrf.mxu1  ;;  %s1247_s16 = smov (!%p211_p12, %s964_s16), 1 }
 0x183   : > { %s667_s4 = sshll.u32 %s1247_s16, 3 }
 0x184   : > { %s214_s25 = scalar_lea.vmem %s1219_s3, %s667_s4 }
 0x1f0   : > { %v518_v42 = vpop.xlane.xlu2 %517 }
 0x1f2   : > { %v523_v43 = vpop.xlane.xlu0 %522 }
 0x1f3   : > { %v525_v44 = vsel %vm524_vm6, %v518_v42, %v523_v43 }
 0x1f4   : > { %527 = vst.msk [vmem:[%s214_s25] sm:$0xff] %vm526_vm7, %v525_v44 }
 0x1f5 PF: > { %s563_s30 = sand.u32 1, %s900_s12   ;;  %p1241_p3 = scmp.ge.s32.totalorder %s912_s15, 2 }
 0x1f6   : > { %s564_s16 = scalar_lea.sflag [#allocation4], %s563_s30 }
 0x1f7   : > { %p694_p13 = pnand %p1241_p3, %p978_p6 }
 0x1f9   : > { %p695_p0 = pneg %p694_p13 }
 0x1fb   : > { %895 = dma.done.wait (%p695_p0), %s564_s16, 128  }
 0x1fc   : > { %897 = vsyncadd (%p695_p0), %s564_s16, 4294967168  ;;  %p18_p5 = scmp.ge.s32.totalorder %s996_s26, 4   ;;  %s1242_s12 = smov %s904_s13 }
 0x1fd   : > { %s1243_s13 = smov %s908_s14  ;;  %s1244_s14 = smov %s1005_s29 }
 0x1fe   : > { %s1245_s15 = smov %s996_s26  ;;  %20 = sbr.rel (!%p18_p5) target bundleno = 6 (0x6), region = 89 }
 0x203   :  { %577 = vsyncpa [#allocation3], 1 }
 0x204   :  { %579 = vsyncpa [#allocation3 + $0x1], 1 }
 0x205   :  { %580 = vsyncpa [#allocation6], 1 }
 0x206   :  { %581 = vsyncpa [#allocation4], 1 }
 0x207   :  { %583 = vsyncpa [#allocation4 + $0x1], 1 }

</bundles_post_ra>
